<compile_context>
chip_gen: v7x
topology: tpu7x:2x2x1
jax: 0.10.0
libtpu: 0.0.40
codegen_flags: <defaults>
</compile_context>

<pallas_src>
import jax
import jax.numpy as jnp
from jax.experimental import pallas as pl
from jax.experimental.pallas import tpu as pltpu

NUM_CLASSES = 80
PADDED_CLASSES = 128            # lane-aligned class dim
_W_RESIDENT_MAX_D = 8192        # use the single-shot (W VMEM-resident) kernel up to here


def _round_up(x, m):
    return ((x + m - 1) // m) * m


def _bce_epilogue(z, tgt):
    # numerically-stable BCE with logits (matches torch BCEWithLogitsLoss):
    #   loss = max(z,0) - z*t + log1p(exp(-|z|))
    # per-class weight torch.ones(80) is a numerical no-op; zero the padded lanes.
    elem = jnp.maximum(z, 0.0) - z * tgt + jnp.log1p(jnp.exp(-jnp.abs(z)))
    lane = jax.lax.broadcasted_iota(jnp.int32, elem.shape, dimension=1)
    return jnp.where(lane < NUM_CLASSES, elem, 0.0)


def bce_kernel_wresident(x_ref, w_ref, b_ref, t_ref, loss_ref):
    # x_ref:    (tb, D_pad)   f32   flattened input row tile (cast to bf16 in-kernel)
    # w_ref:    (D_pad, 128)  bf16  full linear-head weight (VMEM-resident, DMA'd once)
    # b_ref:    (1, 128)      f32   bias
    # t_ref:    (tb, 128)     bf16  K-maxed multi-hot targets
    # loss_ref: (tb, 128)     f32   per-element BCE loss (padded lanes = 0)
    z = jnp.dot(x_ref[...].astype(jnp.bfloat16), w_ref[...],
                preferred_element_type=jnp.float32) + b_ref[...]
    loss_ref[...] = _bce_epilogue(z, t_ref[...].astype(jnp.float32))


def bce_kernel_dsplit(x_ref, w_ref, b_ref, t_ref, loss_ref, acc_ref):
    # Large-D fallback: grid=(nb, nd) with an f32 accumulator over the D axis.
    k = pl.program_id(1)

    @pl.when(k == 0)
    def _():
        acc_ref[...] = jnp.zeros_like(acc_ref)

    acc_ref[...] += jnp.dot(x_ref[...].astype(jnp.bfloat16), w_ref[...],
                            preferred_element_type=jnp.float32)

    @pl.when(k == pl.num_programs(1) - 1)
    def _():
        z = acc_ref[...] + b_ref[...]
        loss_ref[...] = _bce_epilogue(z, t_ref[...].astype(jnp.float32))


def prepare_params(w, b):
    """Pad/cast the 80-class head ONCE, outside the per-step hot path.
    w: (D, 80) f32 -> (D_pad, 128) bf16 (D_pad = round_up(D, 128));
    b: (80,) f32 -> (1, 128) f32."""
    D = w.shape[0]
    D_pad = _round_up(D, 128)
    w_pad = jnp.zeros((D_pad, PADDED_CLASSES), jnp.bfloat16)
    w_pad = w_pad.at[:D, :NUM_CLASSES].set(w.astype(jnp.bfloat16))
    b_pad = jnp.zeros((1, PADDED_CLASSES), jnp.float32)
    b_pad = b_pad.at[0, :NUM_CLASSES].set(b.astype(jnp.float32))
    return w_pad, b_pad


def bce_learner_forward(x_nchw, target_raw, w_pad, b_pad, *, tb=None, td=512):
    """x_nchw: (B, C, H, W) f32; target_raw: (B, K, 80) {0,1};
    w_pad: (D_pad, 128) bf16; b_pad: (1, 128) f32.  Returns scalar summed BCE loss."""
    B = x_nchw.shape[0]
    D = 1
    for s in x_nchw.shape[1:]:
        D *= s
    D_pad = w_pad.shape[0]
    assert D_pad >= D and D_pad % 128 == 0, (D, D_pad)

    # Row tile: as large as practical (cap 128; pass tb=256 for big-B v6e/v7x),
    # while keeping nb>=2 so v7x's two TensorCores both get a parallel block.
    if tb is None:
        tb = min(128, _round_up(B, 8))
        if B > 8 and _round_up(B, 8) // tb < 2:
            tb = max(8, ((tb // 2) + 7) // 8 * 8)
    assert tb % 8 == 0, tb
    B_pad = _round_up(B, tb)
    nb = B_pad // tb

    # x: reshape only (free); the bf16 cast for the MXU happens inside the kernel.
    x_flat = x_nchw.reshape(B, D)
    if (B_pad, D_pad) != (B, D):
        x_flat = jnp.pad(x_flat, ((0, B_pad - B), (0, D_pad - D)))

    # target.max(dim=1)[0] done once in the wrapper (tiny tensor), classes padded 80->128.
    tgt = jnp.max(target_raw, axis=1).astype(jnp.bfloat16)          # (B, 80), exact {0,1}
    tgt = jnp.pad(tgt, ((0, B_pad - B), (0, PADDED_CLASSES - NUM_CLASSES)))

    if D_pad <= _W_RESIDENT_MAX_D:
        # Single-shot kernel: weight VMEM-resident, no D grid axis, no accumulator.
        per_elem = pl.pallas_call(
            bce_kernel_wresident,
            out_shape=jax.ShapeDtypeStruct((B_pad, PADDED_CLASSES), jnp.float32),
            grid_spec=pltpu.PrefetchScalarGridSpec(
                num_scalar_prefetch=0,
                grid=(nb,),
                in_specs=[
                    pl.BlockSpec((tb, D_pad), lambda bi: (bi, 0)),
                    pl.BlockSpec((D_pad, PADDED_CLASSES), lambda bi: (0, 0)),
                    pl.BlockSpec((1, PADDED_CLASSES), lambda bi: (0, 0)),
                    pl.BlockSpec((tb, PADDED_CLASSES), lambda bi: (bi, 0)),
                ],
                out_specs=pl.BlockSpec((tb, PADDED_CLASSES), lambda bi: (bi, 0)),
            ),
            compiler_params=pltpu.CompilerParams(
                dimension_semantics=("parallel",),
                vmem_limit_bytes=32 << 20),
        )(x_flat, w_pad, b_pad, tgt)
    else:
        # Large-D fallback: stream W in (td, 128) chunks, accumulate over the D axis.
        td = min(td, D_pad)
        while D_pad % td != 0:
            td -= 128
        nd = D_pad // td
        per_elem = pl.pallas_call(
            bce_kernel_dsplit,
            out_shape=jax.ShapeDtypeStruct((B_pad, PADDED_CLASSES), jnp.float32),
            grid_spec=pltpu.PrefetchScalarGridSpec(
                num_scalar_prefetch=0,
                grid=(nb, nd),
                in_specs=[
                    pl.BlockSpec((tb, td), lambda bi, ki: (bi, ki)),
                    pl.BlockSpec((td, PADDED_CLASSES), lambda bi, ki: (ki, 0)),
                    pl.BlockSpec((1, PADDED_CLASSES), lambda bi, ki: (0, 0)),
                    pl.BlockSpec((tb, PADDED_CLASSES), lambda bi, ki: (bi, 0)),
                ],
                out_specs=pl.BlockSpec((tb, PADDED_CLASSES), lambda bi, ki: (bi, 0)),
                scratch_shapes=[pltpu.VMEM((tb, PADDED_CLASSES), jnp.float32)],
            ),
            compiler_params=pltpu.CompilerParams(
                dimension_semantics=("parallel", "arbitrary"),
                vmem_limit_bytes=32 << 20),
        )(x_flat, w_pad, b_pad, tgt)

    # loss = loss.sum(); padded lanes are zeroed in-kernel, padded rows sliced off here.
    return jnp.sum(per_elem[:B])


if __name__ == "__main__":
    # TODO(synk): optimizer step / GradScaler / OneCycleLR / EMA update / mAP
    # validation of the training loop are host-side control flow with no Pallas
    # equivalent; only the per-batch loss compute is implemented as a kernel.
    key = jax.random.PRNGKey(0)
    kx, kt, kw, kb = jax.random.split(key, 4)

    B, C, H, W = 16, 4, 16, 16   # small NCHW input -> two 8-row tiles (nb=2)
    K = 4                        # target dim reduced by .max(dim=1)
    D = C * H * W                # 1024 -> W-resident single-shot kernel path

    x = jax.random.normal(kx, (B, C, H, W), dtype=jnp.float32)
    target = (jax.random.uniform(kt, (B, K, NUM_CLASSES)) > 0.7).astype(jnp.float32)

    # deterministic synthetic linear-head params for model_train
    w = 0.02 * jax.random.normal(kw, (D, NUM_CLASSES), dtype=jnp.float32)
    b = 0.01 * jax.random.normal(kb, (NUM_CLASSES,), dtype=jnp.float32)

    # pad/cast head params once, outside the (would-be) training loop
    w_pad, b_pad = prepare_params(w, b)

    loss = bce_learner_forward(x, target, w_pad, b_pad)
    jax.block_until_ready(loss)

    # pure-JAX reference with the same bf16 rounding of the MXU operands
    x_bf = x.reshape(B, D).astype(jnp.bfloat16).astype(jnp.float32)
    w_bf = w.astype(jnp.bfloat16).astype(jnp.float32)
    logits_ref = x_bf @ w_bf + b
    t_ref = target.max(axis=1)
    ref = jnp.sum(jnp.maximum(logits_ref, 0) - logits_ref * t_ref
                  + jnp.log1p(jnp.exp(-jnp.abs(logits_ref))))
    assert jnp.allclose(loss, ref, rtol=2e-3, atol=1e-2), (loss, ref)

    print("KERNEL_OK")
</pallas_src>

<mosaic_0001>
module attributes {stable_mosaic.version = 11 : i64} {
  func.func @bce_kernel_wresident(%arg0: i32, %arg1: memref<8x1024xf32, #tpu.memory_space<vmem>>, %arg2: memref<1024x128xbf16, #tpu.memory_space<vmem>>, %arg3: memref<1x128xf32, #tpu.memory_space<vmem>>, %arg4: memref<8x128xbf16, #tpu.memory_space<vmem>>, %arg5: memref<8x128xf32, #tpu.memory_space<vmem>>) attributes {dimension_semantics = [#tpu.dimension_semantics<parallel>], iteration_bounds = array<i64: 2>, scalar_prefetch = 0 : i64, scratch_operands = 0 : i64, tpu.core_type = #tpu.core_type<tc>, window_params = [{transform_indices = @transform_0, window_bounds = array<i64: 8, 1024>}, {pipeline_mode = #tpu.pipeline_mode<synchronous>, transform_indices = @transform_1, window_bounds = array<i64: 1024, 128>}, {pipeline_mode = #tpu.pipeline_mode<synchronous>, transform_indices = @transform_2, window_bounds = array<i64: 1, 128>}, {transform_indices = @transform_3, window_bounds = array<i64: 8, 128>}, {transform_indices = @transform_4, window_bounds = array<i64: 8, 128>}]} {
    %c0 = arith.constant 0 : index
    %c0_0 = arith.constant 0 : index
    %0 = vector.load %arg1[%c0, %c0_0] : memref<8x1024xf32, #tpu.memory_space<vmem>>, vector<8x1024xf32>
    %1 = arith.truncf %0 : vector<8x1024xf32> to vector<8x1024xbf16>
    %c0_1 = arith.constant 0 : index
    %c0_2 = arith.constant 0 : index
    %2 = vector.load %arg2[%c0_1, %c0_2] : memref<1024x128xbf16, #tpu.memory_space<vmem>>, vector<1024x128xbf16>
    %cst = arith.constant dense<0.000000e+00> : vector<8x128xf32>
    %3 = tpu.matmul %1, %2, %cst {dimension_numbers = #tpu.dot_dimension_numbers<[1], [0], [0], [1], [0, 0, 1, 1], [], []>} : vector<8x1024xbf16>, vector<1024x128xbf16>, vector<8x128xf32> -> vector<8x128xf32>
    %c0_3 = arith.constant 0 : index
    %c0_4 = arith.constant 0 : index
    %4 = vector.load %arg3[%c0_3, %c0_4] : memref<1x128xf32, #tpu.memory_space<vmem>>, vector<1x128xf32>
    %5 = vector.broadcast %4 : vector<1x128xf32> to vector<8x128xf32>
    %6 = arith.addf %3, %5 : vector<8x128xf32>
    %c0_5 = arith.constant 0 : index
    %c0_6 = arith.constant 0 : index
    %7 = vector.load %arg4[%c0_5, %c0_6] : memref<8x128xbf16, #tpu.memory_space<vmem>>, vector<8x128xbf16>
    %8 = arith.extf %7 : vector<8x128xbf16> to vector<8x128xf32>
    %cst_7 = arith.constant 0.000000e+00 : f32
    %9 = vector.broadcast %cst_7 : f32 to vector<8x128xf32>
    %10 = arith.maximumf %6, %9 : vector<8x128xf32>
    %11 = arith.mulf %6, %8 : vector<8x128xf32>
    %12 = arith.subf %10, %11 : vector<8x128xf32>
    %13 = math.absf %6 : vector<8x128xf32>
    %cst_8 = arith.constant 0.000000e+00 : f32
    %14 = vector.broadcast %cst_8 : f32 to vector<8x128xf32>
    %15 = arith.subf %14, %13 : vector<8x128xf32>
    %16 = math.exp %15 : vector<8x128xf32>
    %17 = math.log1p %16 : vector<8x128xf32>
    %18 = arith.addf %12, %17 : vector<8x128xf32>
    %19 = tpu.iota {dimensions = array<i32: 1>} : vector<8x128xi32>
    %c80_i32 = arith.constant 80 : i32
    %20 = vector.broadcast %c80_i32 : i32 to vector<8x128xi32>
    %21 = arith.cmpi slt, %19, %20 : vector<8x128xi32>
    %cst_9 = arith.constant 0.000000e+00 : f32
    %22 = vector.broadcast %cst_9 : f32 to vector<8x128xf32>
    %23 = arith.select %21, %18, %22 : vector<8x128xi1>, vector<8x128xf32>
    %c0_10 = arith.constant 0 : index
    %c0_11 = arith.constant 0 : index
    %24 = vector.load %arg5[%c0_10, %c0_11] : memref<8x128xf32, #tpu.memory_space<vmem>>, vector<8x128xf32>
    tpu.vector_store %arg5[%c0_10, %c0_11], %23 {strides = array<i32>} : memref<8x128xf32, #tpu.memory_space<vmem>>, vector<8x128xf32>,
    return
  }
  func.func @transform_0(%arg0: i32) -> (i32, i32) {
    %c0_i32 = arith.constant 0 : i32
    %c0_i32_0 = arith.constant 0 : i32
    return %arg0, %c0_i32 : i32, i32
  }
  func.func @transform_1(%arg0: i32) -> (i32, i32) {
    %c0_i32 = arith.constant 0 : i32
    %c0_i32_0 = arith.constant 0 : i32
    %c0_i32_1 = arith.constant 0 : i32
    return %c0_i32, %c0_i32_0 : i32, i32
  }
  func.func @transform_2(%arg0: i32) -> (i32, i32) {
    %c0_i32 = arith.constant 0 : i32
    %c0_i32_0 = arith.constant 0 : i32
    %c0_i32_1 = arith.constant 0 : i32
    return %c0_i32, %c0_i32_0 : i32, i32
  }
  func.func @transform_3(%arg0: i32) -> (i32, i32) {
    %c0_i32 = arith.constant 0 : i32
    %c0_i32_0 = arith.constant 0 : i32
    return %arg0, %c0_i32 : i32, i32
  }
  func.func @transform_4(%arg0: i32) -> (i32, i32) {
    %c0_i32 = arith.constant 0 : i32
    %c0_i32_0 = arith.constant 0 : i32
    return %arg0, %c0_i32 : i32, i32
  }
}

</mosaic_0001>

<bundles_post_ra>
// kernel: tpu_custom_call.1
= control target key start
LH: loop header
LB: loop body
LE: loop exit
PB: predicated region body
PF: predicated region fallthrough
CT: control target
= control target key end

     0   :  { %9 = vsyncpa [#allocation3], 0  ;;  %s1744_s0 = inlined_call_operand.hbm [shape: f32[16,1024], index: 0, kind: input, shape index: {}]   ;;  %s1745_s1 = inlined_call_operand.hbm [shape: bf16[1024,128], index: 1, kind: input, shape index: {}]   ;;  %s1746_s2 = inlined_call_operand.vmem [shape: f32[1,128], index: 2, kind: input, shape index: {}]   ;;  %s1747_s3 = inlined_call_operand.vmem [shape: bf16[16,128], index: 3, kind: input, shape index: {}]   ;;  %s1748_s4 = inlined_call_operand.hbm [shape: f32[16,128], index: 4, kind: output, shape index: {}]  }
   0x1   :  { %11 = vsyncpa [#allocation3 + $0x1], 0 }
   0x2   :  { %12 = vsyncpa [#allocation6], 0 }
   0x3   :  { %13 = vsyncpa [#allocation4], 0 }
   0x4   :  { %15 = vsyncpa [#allocation4 + $0x1], 0  ;;  %s1529_s15 = smov 0   ;;  %s1531_s16 = smov 0  }
   0x5   :  { %s1533_s17 = smov 0   ;;  %s1535_s18 = smov 0  }
   0x6 LB: > { %s1550_s19 = sadd.s32 4294967295, %s1497_s18   ;;  %s1072_s20 = sadd.s32 4294967294, %s1497_s18   ;;  %s1497_s18 = sphi %s1535_s18, %s1768_s18   ;;  %s1493_s17 = sphi %s1533_s17, %s1767_s17   ;;  %s1489_s16 = sphi %s1531_s16, %s1766_s16   ;;  %s1485_s15 = sphi %s1529_s15, %s1765_s15  }
   0x7   : > { %p41_p0 = scmp.ne.s32.totalorder %s1489_s16, %s1485_s15  ;;  %p1749_p1 = scmp.eq.s32.totalorder %s1550_s19, 0 }
   0x8   : > { %p139_p3 = scmp.eq.s32.totalorder %s1072_s20, 1  ;;  %p1073_p5 = scmp.ge.s32.totalorder %s1497_s18, 1 }
   0x9   : > { %p1559_p4 = por %p1749_p1, %p41_p0  ;;  %p146_p7 = scmp.lt.s32.totalorder %s1497_s18, 3 }
   0xa   : > { %p1564_p6 = por %p139_p3, %p41_p0  ;;  %s1499_s24 = smov [#allocation5]  }
   0xb   : > { %s1752_s21 = scalar_select %p1559_p4, 1, 0 }
   0xc   : > { %s1753_s22 = scalar_select %p1564_p6, 1, 0 }
   0xd   : > { %p1569_p8 = pnand %p1073_p5, %p146_p7  ;;  %s158_s25 = sshll.u32 %s1499_s24, 4  ;;  %s1573_s25 = int_to_ptr.vmem [resolvable:$true] %s158_s25 }
   0xe   : > { %s1585_s27 = sadd.s32 1, %s1497_s18   ;;  %s28_s28 = sadd.s32 1, %s1493_s17 }
   0xf   : > { %s1754_s23 = scalar_select %p1569_p8, 1, 0 }
  0x10   : > { %p1250_p9 = pneg %p1569_p8  ;;  %s25_s29 = ssub.s32 %s1497_s18, %s1585_s27 }
  0x11   : > { %s1369_s6 = scalar_lea.hbm %s1745_s1, 8192 }
  0x12   : > { %p1580_p11 = pnand %p1250_p9, %p1749_p1  ;;  %p1370_p12 = scmp.ne.s32.totalorder %s1745_s1, %s1369_s6 }
  0x13   : > { %p1376_p5 = scmp.lt.u32.totalorder %s1369_s6, %s1745_s1 }
  0x14   : > { %p1371_p13 = pneg %p1580_p11 }
  0x16   : > { %p1372_p0 = pnand %p1371_p13, %p1370_p12 }
  0x18   : > { %p1373_p3 = pneg %p1372_p0 }
  0x1a   : > { %p1378_p7 = pnand %p1376_p5, %p1373_p3 }
  0x1c   : > { %1381 = shalt.err (!%p1378_p7)
}
  0x1d   : > { %s1382_s11 = scalar_lea.vmem %s1573_s25, 8192  ;;  %p1390_p2 = scmp.lt.s32.totalorder %s1573_s25, %s1573_s25 }
  0x1e   : > { %p1383_p9 = scmp.ne.s32.totalorder %s1573_s25, %s1382_s11  ;;  %p1391_p6 = scmp.lt.s32.totalorder %s1382_s11, %s1382_s11 }
  0x20   : > { %p1385_p10 = pnand %p1383_p9, %p1371_p13  ;;  %p1392_p4 = por %p1391_p6, %p1390_p2 }
  0x22   : > { %p1386_p1 = pneg %p1385_p10 }
  0x24   : > { %p1393_p8 = pnand %p1392_p4, %p1386_p1 }
  0x26   : > { %1396 = shalt.err (!%p1393_p8)
}
  0x27   : > { %s1500_s12 = smov 64   ;;  %s1501_s13 = smov 4  }
  0x28   : > { %1253 = dma.hbm_to_vmem [thread:$0]  (!%p1580_p11), %s1745_s1, 8192, %s1573_s25, [#allocation6], %s1500_s12, %s1500_s12, %s1501_s13  }
  0x29   : > { %p26_p2 = scmp.eq.s32.totalorder %s25_s29, 0  ;;  %p35_p1 = scmp.ne.s32.totalorder %s1493_s17, %s1489_s16 }
  0x2a   : > { %p36_p4 = scmp.eq.s32.totalorder %s1497_s18, 0  ;;  %p1263_p6 = scmp.lt.s32.totalorder %s1497_s18, 2 }
  0x2b   : > { %s1616_s24 = scalar_select %p26_p2, %s1493_s17, %s28_s28  }
  0x2c   : > { %p37_p8 = por %p36_p4, %p35_p1  ;;  %p1756_p10 = scmp.eq.s32.totalorder %s1550_s19, 1 }
  0x2d   : > { %s175_s5 = sand.u32 1, %s1493_s17   ;;  %s1153_s6 = sshll.u32 %s1497_s18, 10 }
  0x2e   : > { %p1620_p12 = por %p1756_p10, %p35_p1  ;;  %s1076_s7 = sshll.u32 %s175_s5, 6 }
  0x2f   : > { %s1629_s9 = scalar_lea.hbm %s1744_s0, %s1153_s6  ;;  %s179_s25 = scalar_lea.vmem [#allocation2], %s1076_s7 }
  0x30   : > { %s187_s28 = sshll.u32 %s179_s25, 4  ;;  %p1631_p11 = pnand %p1263_p6, %p37_p8  ;;  %s1635_s28 = int_to_ptr.vmem [resolvable:$true] %s187_s28 }
  0x31   : > { %s176_s10 = scalar_lea.sflag [#allocation3], %s175_s5  ;;  %s1397_s11 = scalar_lea.hbm %s1629_s9, 1024 }
  0x32   : > { %p1398_p13 = scmp.ne.s32.totalorder %s1629_s9, %s1397_s11  ;;  %p1399_p0 = pneg %p1631_p11 }
  0x33   : > { %s1402_s14 = scalar_lea.hbm %s1744_s0, 2048  ;;  %p1403_p7 = scmp.lt.u32.totalorder %s1629_s9, %s1744_s0 }
  0x34   : > { %p1400_p3 = pnand %p1399_p0, %p1398_p13  ;;  %p1404_p9 = scmp.lt.u32.totalorder %s1402_s14, %s1397_s11 }
  0x35   : > { %p1406_p1 = scmp.lt.u32.totalorder %s1397_s11, %s1629_s9 }
  0x36   : > { %p1401_p5 = pneg %p1400_p3  ;;  %p1405_p2 = por %p1404_p9, %p1403_p7 }
  0x38   : > { %p1407_p4 = por %p1406_p1, %p1405_p2 }
  0x3a   : > { %p1408_p6 = pnand %p1407_p4, %p1401_p5 }
  0x3c   : > { %1411 = shalt.err (!%p1408_p6)
}
  0x3d   : > { %s1412_s5 = scalar_lea.vmem %s1635_s28, 1024  ;;  %s1502_s7 = smov [#allocation2]  }
  0x3e   : > { %p1413_p8 = scmp.ne.s32.totalorder %s1635_s28, %s1412_s5  ;;  %s1417_s26 = sshll.u32 %s1502_s7, 4  ;;  %s1418_s26 = int_to_ptr.vmem [resolvable:$false] %s1417_s26 }
  0x3f   : > { %s1419_s8 = scalar_lea.vmem %s1418_s26, 2048  ;;  %p1420_p3 = scmp.lt.s32.totalorder %s1635_s28, %s1418_s26 }
  0x40   : > { %p1415_p10 = pnand %p1413_p8, %p1399_p0  ;;  %p1421_p7 = scmp.lt.s32.totalorder %s1419_s8, %s1412_s5 }
  0x42   : > { %p1416_p13 = pneg %p1415_p10  ;;  %p1422_p9 = por %p1421_p7, %p1420_p3 }
  0x44   : > { %p1423_p2 = pnand %p1422_p9, %p1416_p13 }
  0x46   : > { %1426 = shalt.err (!%p1423_p2)
}
  0x47   : > { %1257 = dma.hbm_to_vmem [thread:$0]  (!%p1631_p11), %s1629_s9, 1024, %s1635_s28, %s176_s10  }
  0x48   : > { %p1759_p5 = scmp.ne.s32.totalorder %s1754_s23, 0 }
  0x49   : > { %s1665_s25 = sand.u32 (!%p1759_p5), 1, %s1489_s16   ;;  %p1760_p0 = scmp.ne.s32.totalorder (!%p1759_p5), %s1752_s21, 0 }
  0x4a   : > { %203 = sbr.rel (%p1759_p5) target bundleno = 420 (0x1a4), region = 36  ;;  %s1080_s11 = sshll.u32 (!%p1759_p5), %s1665_s25, 6 }
  0x4b   : > { %s206_s12 = scalar_lea.sflag (!%p1759_p5), [#allocation3], %s1665_s25  ;;  %s1669_s13 = scalar_lea.vmem (!%p1759_p5), [#allocation2], %s1080_s11 }
  0x51   : > { %1472 = dma.done.wait (%p1760_p0), %s206_s12, 1024  }
  0x52   : > { %1474 = vsyncadd (%p1760_p0), %s206_s12, 4294966272  ;;  %p1761_p11 = scmp.eq.s32.totalorder %s1550_s19, 0 }
  0x54   : > { %1476 = dma.done.wait (%p1761_p11), [#allocation6], 8192   ;;  %p1762_p1 = pmov %p1761_p11 }
  0x55   : > { %v1301_v0 = vld [vmem:[#allocation5 + $0x40] sm:$0xff]   ;;  %v1305_v4 = vld [vmem:[#allocation5 + $0x48] sm:$0xff]   ;;  %v1309_v8 = vld [vmem:[#allocation5 + $0x50] sm:$0xff]   ;;  %p242_p4 = scmp.lt.s32.totalorder %s1550_s19, 1  ;;  %s1082_s20 = sshll.u32 %s1665_s25, 3 }
  0x56   : > { %1478 = vsyncadd (%p1762_p1), [#allocation6], 4294959104  ;;  %v1302_v1 = vld [vmem:[#allocation5 + $0xc0] sm:$0xff]   ;;  %1154 = vmatprep.subr.bf16.mxu0 %v1301_v0  ;;  %v1306_v5 = vld [vmem:[#allocation5 + $0xc8] sm:$0xff]   ;;  %s1150_s6 = sshll.u32 %s1550_s19, 7  ;;  %s241_s5 = scalar_lea.vmem [#allocation7], %s1082_s20 }
  0x57   : > { %v1303_v2 = vld [vmem:[#allocation5] sm:$0xff]   ;;  %1176 = vmatprep.subr.bf16.mxu1 %v1302_v1  ;;  %v1307_v6 = vld [vmem:[#allocation5 + $0x8] sm:$0xff]   ;;  %v1310_v9 = vld [vmem:[#allocation5 + $0xd0] sm:$0xff]   ;;  %s243_s9 = scalar_select %p242_p4, %s1550_s19, 1 }
  0x58   : > { %v1304_v3 = vld [vmem:[#allocation5 + $0x80] sm:$0xff]   ;;  %1155 = vmatpush3.bf16.msra.mxu0 %v1303_v2  ;;  %v1308_v7 = vld [vmem:[#allocation5 + $0x88] sm:$0xff]   ;;  %v1311_v10 = vld [vmem:[#allocation5 + $0x10] sm:$0xff]   ;;  %s980_s7 = sshll.u32 %s241_s5, 4  ;;  %s1700_s11 = scalar_lea.hbm %s1748_s4, %s1150_s6  ;;  %s1702_s7 = int_to_ptr.vmem [resolvable:$true] %s980_s7 }
  0x59   : > { %1177 = vmatpush3.bf16.msra.mxu1 %v1304_v3  ;;  %1156 = vmatprep.subr.bf16.mxu0 %v1305_v4  ;;  %v1312_v11 = vld [vmem:[#allocation5 + $0x90] sm:$0xff]   ;;  %v1313_v12 = vld [vmem:[#allocation5 + $0x58] sm:$0xff]   ;;  %v1317_v16 = vld [vmem:[#allocation5 + $0x60] sm:$0xff]   ;;  %s1083_s28 = sshll.u32 %s243_s9, 2  ;;  %s967_s12 = scalar_lea.sflag [#allocation4], %s1665_s25 }
  0x5a   : > { %1178 = vmatprep.subr.bf16.mxu1 %v1306_v5  ;;  %v1314_v13 = vld [vmem:[#allocation5 + $0xd8] sm:$0xff]   ;;  %v1318_v17 = vld [vmem:[#allocation5 + $0xe0] sm:$0xff]   ;;  %v1321_v20 = vld [vmem:[#allocation5 + $0x68] sm:$0xff]   ;;  %s245_s14 = scalar_lea.vmem %s1747_s3, %s1083_s28  ;;  %s1503_s19 = smov [#allocation7]  }
  0x5b   : > { %v1315_v14 = vld [vmem:[#allocation5 + $0x18] sm:$0xff]   ;;  %v1319_v18 = vld [vmem:[#allocation5 + $0x20] sm:$0xff]   ;;  %v1322_v21 = vld [vmem:[#allocation5 + $0xe8] sm:$0xff]   ;;  %s1431_s21 = sshll.u32 %s1503_s19, 4  ;;  %s1432_s21 = int_to_ptr.vmem [resolvable:$false] %s1431_s21 }
  0x5c   : > { %1157 = vmatpush3.bf16.msra.mxu0 %v1307_v6  ;;  %v1316_v15 = vld [vmem:[#allocation5 + $0x98] sm:$0xff]   ;;  %v1320_v19 = vld [vmem:[#allocation5 + $0xa0] sm:$0xff]   ;;  %v1323_v22 = vld [vmem:[#allocation5 + $0x28] sm:$0xff]   ;;  %s1433_s23 = scalar_lea.vmem %s1432_s21, 256  ;;  %p1434_p13 = scmp.lt.s32.totalorder %s1702_s7, %s1432_s21 }
  0x5d   : > { %1179 = vmatpush3.bf16.msra.mxu1 %v1308_v7  ;;  %1158 = vmatprep.subr.bf16.mxu0 %v1309_v8  ;;  %v1324_v23 = vld [vmem:[#allocation5 + $0xa8] sm:$0xff]   ;;  %v1325_v24 = vld [vmem:[#allocation5 + $0x70] sm:$0xff]   ;;  %v1329_v28 = vld [vmem:[#allocation5 + $0x78] sm:$0xff]  }
  0x5e   : > { %1180 = vmatprep.subr.bf16.mxu1 %v1310_v9  ;;  %v1326_v25 = vld [vmem:[#allocation5 + $0xf0] sm:$0xff]   ;;  %v1330_v29 = vld [vmem:[#allocation5 + $0xf8] sm:$0xff]   ;;  %v248_v32 = vld [vmem:[%s1669_s13 + $0x8] sm:$0xff] }
  0x5f   : > { %v1327_v26 = vld [vmem:[#allocation5 + $0x30] sm:$0xff]   ;;  %v1331_v30 = vld [vmem:[#allocation5 + $0x38] sm:$0xff]   ;;  %v247_v34 = vld [vmem:[%s1669_s13] sm:$0xff]  ;;  %v256_v35 = vpack.c.bf16 %v248_v32, %v248_v32 }
  0x60   : > { %1159 = vmatpush3.bf16.msra.mxu0 %v1311_v10  ;;  %v1328_v27 = vld [vmem:[#allocation5 + $0xb0] sm:$0xff]   ;;  %v1332_v31 = vld [vmem:[#allocation5 + $0xb8] sm:$0xff]   ;;  %v255_v37 = vpack.c.bf16 %v247_v34, %v247_v34  ;;  %v1333_v40 = vld [vmem:[#allocation5 + $0x140] sm:$0xff]  }
  0x61   : > { %1181 = vmatpush3.bf16.msra.mxu1 %v1312_v11  ;;  %1160 = vmatprep.subr.bf16.mxu0 %v1313_v12  ;;  %v250_v33 = vld [vmem:[%s1669_s13 + $0x18] sm:$0xff]  ;;  %v249_v38 = vld [vmem:[%s1669_s13 + $0x10] sm:$0xff]  ;;  %v1334_v41 = vld [vmem:[#allocation5 + $0x1c0] sm:$0xff]  }
  0x62   : > { %1182 = vmatprep.subr.bf16.mxu1 %v1314_v13  ;;  %v258_v36 = vpack.c.bf16 %v250_v33, %v250_v33  ;;  %v257_v39 = vpack.c.bf16 %v249_v38, %v249_v38  ;;  %814 = vmatprep.mubr.bf16.mxu0 %v256_v35  ;;  %v1335_v42 = vld [vmem:[#allocation5 + $0x100] sm:$0xff]   ;;  %v1337_v44 = vld [vmem:[#allocation5 + $0x148] sm:$0xff]   ;;  %v1341_v48 = vld [vmem:[#allocation5 + $0x150] sm:$0xff]  }
  0x63   : > { %v1336_v43 = vld [vmem:[#allocation5 + $0x180] sm:$0xff]   ;;  %v1338_v45 = vld [vmem:[#allocation5 + $0x1c8] sm:$0xff]   ;;  %v1342_v49 = vld [vmem:[#allocation5 + $0x1d0] sm:$0xff]  }
  0x64   : > { %1161 = vmatpush3.bf16.msra.mxu0 %v1315_v14  ;;  %854 = vmatprep.mubr.bf16.mxu1 %v258_v36  ;;  %v1339_v46 = vld [vmem:[#allocation5 + $0x108] sm:$0xff]   ;;  %v1343_v50 = vld [vmem:[#allocation5 + $0x110] sm:$0xff]   ;;  %v1345_v52 = vld [vmem:[#allocation5 + $0x158] sm:$0xff]  }
  0x65   : > { %1183 = vmatpush3.bf16.msra.mxu1 %v1316_v15  ;;  %1162 = vmatprep.subr.bf16.mxu0 %v1317_v16  ;;  %v1340_v47 = vld [vmem:[#allocation5 + $0x188] sm:$0xff]   ;;  %v1344_v51 = vld [vmem:[#allocation5 + $0x190] sm:$0xff]   ;;  %v1346_v53 = vld [vmem:[#allocation5 + $0x1d8] sm:$0xff]  }
  0x66   : > { %1184 = vmatprep.subr.bf16.mxu1 %v1318_v17  ;;  %v1347_v54 = vld [vmem:[#allocation5 + $0x118] sm:$0xff]   ;;  %v1349_v56 = vld [vmem:[#allocation5 + $0x160] sm:$0xff]   ;;  %v1353_v60 = vld [vmem:[#allocation5 + $0x168] sm:$0xff]  }
  0x67   : > { %v1348_v55 = vld [vmem:[#allocation5 + $0x198] sm:$0xff]   ;;  %v1350_v57 = vld [vmem:[#allocation5 + $0x1e0] sm:$0xff]   ;;  %v1354_v61 = vld [vmem:[#allocation5 + $0x1e8] sm:$0xff]  }
  0x68   : > { %1163 = vmatpush3.bf16.msra.mxu0 %v1319_v18  ;;  %v1351_v58 = vld [vmem:[#allocation5 + $0x120] sm:$0xff]   ;;  %v1355_v62 = vld [vmem:[#allocation5 + $0x128] sm:$0xff]   ;;  %v1357_v0 = vld [vmem:[#allocation5 + $0x170] sm:$0xff]  }
  0x69   : > { %1185 = vmatpush3.bf16.msra.mxu1 %v1320_v19  ;;  %1164 = vmatprep.subr.bf16.mxu0 %v1321_v20  ;;  %v1352_v59 = vld [vmem:[#allocation5 + $0x1a0] sm:$0xff]   ;;  %v1356_v63 = vld [vmem:[#allocation5 + $0x1a8] sm:$0xff]   ;;  %v1358_v1 = vld [vmem:[#allocation5 + $0x1f0] sm:$0xff]  }
  0x6a   : > { %1186 = vmatprep.subr.bf16.mxu1 %v1322_v21  ;;  %v1359_v2 = vld [vmem:[#allocation5 + $0x130] sm:$0xff]   ;;  %v1361_v4 = vld [vmem:[#allocation5 + $0x178] sm:$0xff]   ;;  %v252_v8 = vld [vmem:[%s1669_s13 + $0x28] sm:$0xff] }
  0x6b   : > { %v1360_v3 = vld [vmem:[#allocation5 + $0x1b0] sm:$0xff]   ;;  %v1362_v5 = vld [vmem:[#allocation5 + $0x1f8] sm:$0xff]   ;;  %v260_v10 = vpack.c.bf16 %v252_v8, %v252_v8  ;;  %v251_v12 = vld [vmem:[%s1669_s13 + $0x20] sm:$0xff] }
  0x6c   : > { %1165 = vmatpush3.bf16.msra.mxu0 %v1323_v22  ;;  %v1363_v6 = vld [vmem:[#allocation5 + $0x138] sm:$0xff]   ;;  %v253_v13 = vld [vmem:[%s1669_s13 + $0x30] sm:$0xff]  ;;  %v259_v14 = vpack.c.bf16 %v251_v12, %v251_v12  ;;  %v1084_v18 = vld [vmem:[%s1746_s2] ss:$0 sm:$0xff] }
  0x6d   : > { %1187 = vmatpush3.bf16.msra.mxu1 %v1324_v23  ;;  %1166 = vmatprep.subr.bf16.mxu0 %v1325_v24  ;;  %v1364_v7 = vld [vmem:[#allocation5 + $0x1b8] sm:$0xff]   ;;  %v261_v15 = vpack.c.bf16 %v253_v13, %v253_v13 }
  0x6e   : > { %1188 = vmatprep.subr.bf16.mxu1 %v1326_v25  ;;  %v254_v9 = vld [vmem:[%s1669_s13 + $0x38] sm:$0xff]  ;;  %s1427_s13 = scalar_lea.vmem %s1702_s7, 128 }
  0x6f   : > { %v262_v11 = vpack.c.bf16 %v254_v9, %v254_v9  ;;  %p1428_p6 = scmp.ne.s32.totalorder %s1702_s7, %s1427_s13  ;;  %p1435_p3 = scmp.lt.s32.totalorder %s1433_s23, %s1427_s13 }
  0x70   : > { %1167 = vmatpush3.bf16.msra.mxu0 %v1327_v26 }
  0x71   : > { %1189 = vmatpush3.bf16.msra.mxu1 %v1328_v27  ;;  %1168 = vmatprep.subr.bf16.mxu0 %v1329_v28  ;;  %p1429_p8 = pnand %p1428_p6, %p1620_p12  ;;  %p1436_p7 = por %p1435_p3, %p1434_p13 }
  0x72   : > { %1190 = vmatprep.subr.bf16.mxu1 %v1330_v29 }
  0x73   : > { %p1430_p10 = pneg %p1429_p8 }
  0x74   : > { %1169 = vmatpush3.bf16.msra.mxu0 %v1331_v30 }
  0x75   : > { %1191 = vmatpush3.bf16.msra.mxu1 %v1332_v31  ;;  %1198 = vmatprep.subr.bf16.mxu0 %v1333_v40  ;;  %p1437_p9 = pnand %p1436_p7, %p1430_p10 }
  0x76   : > { %1220 = vmatprep.subr.bf16.mxu1 %v1334_v41 }
  0x77   : > { %815 = vmatmul.mubr.bf16.vlgmr.msra.gmra.mrb[0].mxu0 %v255_v37 }
  0x78   : > { %855 = vmatmul.mubr.bf16.vlgmr.msra.gmra.mrb[0].mxu1 %v257_v39  ;;  %1199 = vmatpush3.bf16.msra.mxu0 %v1335_v42 }
  0x79   : > { %1221 = vmatpush3.bf16.msra.mxu1 %v1336_v43  ;;  %1200 = vmatprep.subr.bf16.mxu0 %v1337_v44 }
  0x7a   : > { %1222 = vmatprep.subr.bf16.mxu1 %v1338_v45  ;;  %894 = vmatprep.mubr.bf16.mxu0 %v260_v10 }
  0x7b   : > { %934 = vmatprep.mubr.bf16.mxu1 %v262_v11 }
  0x7c   : > { %1201 = vmatpush3.bf16.msra.mxu0 %v1339_v46  ;;  %v942_v46 = vld [vmem:[%s245_s14] sm:$0xf] }
  0x7d   : > { %1223 = vmatpush3.bf16.msra.mxu1 %v1340_v47  ;;  %1202 = vmatprep.subr.bf16.mxu0 %v1341_v48  ;;  %v943_v48 = vunpack.c.l.bf16 %v942_v46 }
  0x7e   : > { %1224 = vmatprep.subr.bf16.mxu1 %v1342_v49  ;;  %v961_v49 = vlaneseq }
  0x80   : > { %1203 = vmatpush3.bf16.msra.mxu0 %v1343_v50 }
  0x81   : > { %1225 = vmatpush3.bf16.msra.mxu1 %v1344_v51  ;;  %1204 = vmatprep.subr.bf16.mxu0 %v1345_v52 }
  0x82   : > { %1226 = vmatprep.subr.bf16.mxu1 %v1346_v53 }
  0x84   : > { %1205 = vmatpush3.bf16.msra.mxu0 %v1347_v54  ;;  %v962_v54 = vand.u32 127, %v961_v49 }
  0x85   : > { %1227 = vmatpush3.bf16.msra.mxu1 %v1348_v55  ;;  %1206 = vmatprep.subr.bf16.mxu0 %v1349_v56 }
  0x86   : > { %1228 = vmatprep.subr.bf16.mxu1 %v1350_v57  ;;  %vm963_vm1 = vcmp.lt.s32.totalorder %v962_v54, 80 }
  0x88   : > { %1207 = vmatpush3.bf16.msra.mxu0 %v1351_v58 }
  0x89   : > { %1229 = vmatpush3.bf16.msra.mxu1 %v1352_v59  ;;  %1208 = vmatprep.subr.bf16.mxu0 %v1353_v60 }
  0x8a   : > { %1230 = vmatprep.subr.bf16.mxu1 %v1354_v61 }
  0x8c   : > { %1209 = vmatpush3.bf16.msra.mxu0 %v1355_v62 }
  0x8d   : > { %1231 = vmatpush3.bf16.msra.mxu1 %v1356_v63  ;;  %1210 = vmatprep.subr.bf16.mxu0 %v1357_v0 }
  0x8e   : > { %1232 = vmatprep.subr.bf16.mxu1 %v1358_v1 }
  0x90   : > { %1211 = vmatpush3.bf16.msra.mxu0 %v1359_v2 }
  0x91   : > { %1233 = vmatpush3.bf16.msra.mxu1 %v1360_v3  ;;  %1212 = vmatprep.subr.bf16.mxu0 %v1361_v4 }
  0x92   : > { %1234 = vmatprep.subr.bf16.mxu1 %v1362_v5 }
  0x94   : > { %1213 = vmatpush3.bf16.msra.mxu0 %v1363_v6 }
  0x95   : > { %1235 = vmatpush3.bf16.msra.mxu1 %v1364_v7 }
  0x97   : > { %895 = vmatmul.mubr.bf16.vlgmr.msra.gmra.mrb[4].mxu0 %v259_v14 }
  0x98   : > { %935 = vmatmul.mubr.bf16.vlgmr.msra.gmra.mrb[4].mxu1 %v261_v15 }
 0x14a   : > { %v1170_v16 = vpop.f32.mrb[0].mxu0 }
 0x14b   : > { %v1192_v17 = vpop.f32.mrb[0].mxu1  ;;  %v1171_v19 = vpop.f32.mrb[1].mxu0 }
 0x14c   : > { %v1193_v20 = vpop.f32.mrb[1].mxu1  ;;  %v1172_v21 = vadd.f32 %v1171_v19, %v1170_v16  ;;  %v1173_v23 = vpop.f32.mrb[2].mxu0 }
 0x14d   : > { %v1194_v22 = vadd.f32 %v1193_v20, %v1192_v17  ;;  %v1195_v24 = vpop.f32.mrb[2].mxu1  ;;  %v1174_v25 = vpop.f32.mrb[3].mxu0 }
 0x14e   : > { %v1196_v26 = vpop.f32.mrb[3].mxu1  ;;  %v817_v27 = vadd.f32 %v1172_v21, %v1084_v18 }
 0x150   : > { %v857_v28 = vadd.f32 %v1194_v22, %v817_v27 }
 0x16a   : > { %v1214_v29 = vpop.f32.mrb[4].mxu0 }
 0x16b   : > { %v1236_v30 = vpop.f32.mrb[4].mxu1  ;;  %v1215_v31 = vpop.f32.mrb[5].mxu0 }
 0x16c   : > { %v1216_v32 = vadd.f32 %v1215_v31, %v1214_v29  ;;  %v1237_v33 = vpop.f32.mrb[5].mxu1  ;;  %v1217_v34 = vpop.f32.mrb[6].mxu0 }
 0x16d   : > { %v1238_v35 = vadd.f32 %v1237_v33, %v1236_v30  ;;  %v1239_v36 = vpop.f32.mrb[6].mxu1  ;;  %v1218_v37 = vpop.f32.mrb[7].mxu0 }
 0x16e   : > { %v897_v38 = vadd.f32 %v1216_v32, %v857_v28  ;;  %v1240_v39 = vpop.f32.mrb[7].mxu1 }
 0x170   : > { %v937_v40 = vadd.f32 %v1238_v35, %v897_v38 }
 0x172   : > { %v947_v41 = vand.u32 2147483647, %v937_v40  ;;  %v944_v51 = vmax.f32 %v937_v40, 0.0  ;;  %v945_v52 = vmul.f32 %v943_v48, %v937_v40 }
 0x174   : > { %v948_v42 = vsub.f32 0.0, %v947_v41  ;;  %v946_v58 = vsub.f32 %v944_v51, %v945_v52 }
 0x176   : > { %v949_v43 = vmul.f32 1.442695, %v948_v42 }
 0x178   : > { %1365 = vpow2.f32 %v949_v43 }
 0x182   : > { %v1366_v44 = vpop.eup %1365 }
 0x183   : > { %v951_v45 = vadd.f32 1.0, %v1366_v44  ;;  %v954_v47 = vmul.f32 -0.5, %v1366_v44  ;;  %v957_v53 = vand.u32 2147483647, %v1366_v44 }
 0x185   : > { %1367 = vlog2.f32 %v951_v45  ;;  %v955_v50 = vadd.f32 1.0, %v954_v47  ;;  %vm958_vm0 = vcmp.lt.f32.partialorder %v957_v53, 0.0004427343 }
 0x187   : > { %v956_v57 = vmul.f32 %v1366_v44, %v955_v50 }
 0x18f   : > { %v1368_v55 = vpop.eup %1367 }
 0x190   : > { %v953_v56 = vmul.f32 0.6931472, %v1368_v55 }
 0x192   : > { %v959_v59 = vsel %vm958_vm0, %v956_v57, %v953_v56 }
 0x193   : > { %v960_v60 = vadd.f32 %v959_v59, %v946_v58 }
 0x195   : > { %v964_v61 = vsel %vm963_vm1, %v960_v60, 0.0 }
 0x196   : > { %965 = vst [vmem:[%s241_s5] sm:$0xff] %v964_v61 }
 0x197   : > { %1440 = shalt.err (!%p1437_p9)
}
 0x198   : > { %s1441_s25 = scalar_lea.hbm %s1700_s11, 128  ;;  %s1445_s29 = scalar_lea.hbm %s1748_s4, 256 }
 0x199   : > { %p1442_p2 = scmp.ne.s32.totalorder %s1700_s11, %s1441_s25  ;;  %p1446_p11 = scmp.lt.u32.totalorder %s1700_s11, %s1748_s4 }
 0x19a   : > { %p1447_p1 = scmp.lt.u32.totalorder %s1445_s29, %s1441_s25  ;;  %p1449_p6 = scmp.lt.u32.totalorder %s1441_s25, %s1700_s11 }
 0x19b   : > { %p1443_p5 = pnand %p1442_p2, %p1620_p12 }
 0x19c   : > { %p1448_p4 = por %p1447_p1, %p1446_p11 }
 0x19d   : > { %p1444_p0 = pneg %p1443_p5 }
 0x19e   : > { %p1450_p8 = por %p1449_p6, %p1448_p4 }
 0x1a0   : > { %p1451_p10 = pnand %p1450_p8, %p1444_p0 }
 0x1a2   : > { %1454 = shalt.err (!%p1451_p10)
}
 0x1a3   : > { %1248 = dma.vmem_to_hbm [thread:$0]  (%p1620_p12), %s1702_s7, 128, %s1700_s11, %s967_s12  }
 0x1a4 PF: > { %s992_s20 = sand.u32 1, %s1485_s15   ;;  %p1763_p13 = scmp.ne.s32.totalorder %s1753_s22, 0 }
 0x1a5   : > { %p1764_p3 = scmp.ge.s32.totalorder %s1497_s18, 2  ;;  %s993_s6 = scalar_lea.sflag [#allocation4], %s992_s20 }
 0x1a7   : > { %p1259_p7 = pnand %p1764_p3, %p1763_p13 }
 0x1a9   : > { %1480 = dma.done.wait (!%p1259_p7), %s993_s6, 128  }
 0x1aa   : > { %1482 = vsyncadd (!%p1259_p7), %s993_s6, 4294967168  ;;  %p18_p9 = scmp.ge.s32.totalorder %s1585_s27, 4   ;;  %s1765_s15 = smov %s1489_s16 }
 0x1ab   : > { %s1766_s16 = smov %s1493_s17  ;;  %s1767_s17 = smov %s1616_s24 }
 0x1ac   : > { %s1768_s18 = smov %s1585_s27  ;;  %20 = sbr.rel (!%p18_p9) target bundleno = 6 (0x6), region = 88 }
 0x1b3   :  { %998 = vsyncpa [#allocation3], 1 }
 0x1b4   :  { %1000 = vsyncpa [#allocation3 + $0x1], 1 }
 0x1b5   :  { %1001 = vsyncpa [#allocation6], 1 }
 0x1b6   :  { %1002 = vsyncpa [#allocation4], 1 }
 0x1b7   :  { %1004 = vsyncpa [#allocation4 + $0x1], 1 }

</bundles_post_ra>
